<compile_context>
chip_gen: v5e
topology: v5e:2x2
jax: 0.10.0
libtpu: 0.0.40
codegen_flags: <defaults>
</compile_context>

<pallas_src>
import functools

import jax
import jax.numpy as jnp
from jax.experimental import pallas as pl
from jax.experimental.pallas import tpu as pltpu


_SINGLE_BLOCK_MAX_BYTES = 4 * 1024 * 1024   # whole-array-in-one-block threshold
_TARGET_TILE_BYTES = 2 * 1024 * 1024        # per-input-buffer tile target (tiled path)


def _neg_mean_single_kernel(x_ref, o_ref, *, total_elems):
    # Whole lane-dense slab in one VMEM block: one pass, one cross-lane reduce.
    o_ref[0, 0] = -jnp.sum(x_ref[...].astype(jnp.float32)) / jnp.float32(total_elems)


def _partial_sum_tiled_kernel(x_ref, o_ref, acc_ref):
    # Per step: pure VPU elementwise accumulate into a VMEM vector accumulator.
    # The expensive cross-lane (XLU) reduce happens exactly once per grid-major slice,
    # in its final step; negate/divide happen in the (tiny) wrapper combine.
    k = pl.program_id(1)

    @pl.when(k == 0)
    def _():
        acc_ref[...] = jnp.zeros_like(acc_ref)

    acc_ref[...] += x_ref[...].astype(jnp.float32)

    @pl.when(k == pl.num_programs(1) - 1)
    def _():
        o_ref[0, 0] = jnp.sum(acc_ref[...])


def _choose_lane_dense_shape(n):
    """Pick (rows, lanes, padded_n) so a length-n flat array (zero-padded to padded_n)
    can be viewed as (rows, lanes) with lanes % 128 == 0 (lane-dense)."""
    # Prefer the largest lane width that also keeps rows a multiple of 8 (dense sublanes).
    for lanes in (1024, 512, 256, 128):
        if n % lanes == 0 and (n // lanes) % 8 == 0:
            return n // lanes, lanes, n
    for lanes in (1024, 512, 256, 128):
        if n % lanes == 0:
            return n // lanes, lanes, n
    # Ragged size: zero-pad to a multiple of (8, 128). Zeros don't change the sum and
    # we divide by the true element count.
    lanes = 128
    padded_n = ((n + 8 * lanes - 1) // (8 * lanes)) * (8 * lanes)
    return padded_n // lanes, lanes, padded_n


def criterion_adv_for_g(d_out_S):
    """wgan-gp generator adversarial loss: -mean(d_out_S). Returns an f32 scalar."""
    n = int(d_out_S.size)
    dtype = d_out_S.dtype
    itemsize = jnp.dtype(dtype).itemsize

    rows, lanes, padded_n = _choose_lane_dense_shape(n)
    flat = d_out_S.reshape(-1)

    cost = pl.CostEstimate(flops=n, transcendentals=0,
                           bytes_accessed=n * itemsize + 4)

    # ---------------- small-input fast path: single VMEM block -------------------
    if rows * lanes * itemsize <= _SINGLE_BLOCK_MAX_BYTES:
        if padded_n != n:
            flat = jnp.concatenate([flat, jnp.zeros((padded_n - n,), dtype)])
        x2d = flat.reshape(rows, lanes)
        out = pl.pallas_call(
            functools.partial(_neg_mean_single_kernel, total_elems=n),
            out_shape=jax.ShapeDtypeStruct((1, 1), jnp.float32),
            grid_spec=pltpu.PrefetchScalarGridSpec(
                num_scalar_prefetch=0,
                grid=(1,),
                in_specs=[pl.BlockSpec((rows, lanes), lambda i: (0, 0))],
                out_specs=pl.BlockSpec((1, 1), lambda i: (0, 0),
                                       memory_space=pltpu.SMEM),
            ),
            cost_estimate=cost,
        )(x2d)
        return out[0, 0]

    # -------- large-input path: big lane-dense tiles + VMEM vector accumulator ----
    target_rows = max(8, (_TARGET_TILE_BYTES // (lanes * itemsize)) // 8 * 8)

    tile_rows = None
    t = min(target_rows, (rows // 8) * 8)
    while t >= 8:
        if rows % t == 0:          # multiple-of-8 divisor -> full, (8,128)-aligned blocks
            tile_rows = t
            break
        t -= 8
    if tile_rows is None:
        # No suitable divisor: zero-pad rows up to a multiple of the target tile so
        # every block is full and aligned (never degrade to 1-row tiles).
        tile_rows = min(target_rows, ((rows + 7) // 8) * 8)
        padded_rows = ((rows + tile_rows - 1) // tile_rows) * tile_rows
        padded_n = padded_rows * lanes
        rows = padded_rows

    if padded_n != n:
        flat = jnp.concatenate([flat, jnp.zeros((padded_n - n,), dtype)])
    x2d = flat.reshape(rows, lanes)

    num_tiles = rows // tile_rows
    # Split the work along a leading "parallel" grid axis so megacore parts
    # (v7x: 2 TensorCores) each stream their own half of HBM.
    n_splits = 2 if (num_tiles % 2 == 0 and num_tiles >= 4) else 1
    tiles_per_split = num_tiles // n_splits

    partials = pl.pallas_call(
        _partial_sum_tiled_kernel,
        out_shape=jax.ShapeDtypeStruct((n_splits, 1), jnp.float32),
        grid_spec=pltpu.PrefetchScalarGridSpec(
            num_scalar_prefetch=0,
            grid=(n_splits, tiles_per_split),
            in_specs=[pl.BlockSpec((tile_rows, lanes),
                                   lambda s, k: (s * tiles_per_split + k, 0))],
            out_specs=pl.BlockSpec((1, 1), lambda s, k: (s, 0),
                                   memory_space=pltpu.SMEM),
            scratch_shapes=[pltpu.VMEM((tile_rows, lanes), jnp.float32)],
        ),
        compiler_params=pltpu.CompilerParams(
            dimension_semantics=("parallel", "arbitrary"),
            vmem_limit_bytes=32 * 1024 * 1024,
        ),
        cost_estimate=cost,
    )(x2d)

    # Tiny scalar combine (n_splits values): negate + divide by the TRUE element count.
    return -(jnp.sum(partials) / jnp.float32(n))


if __name__ == "__main__":
    key = jax.random.PRNGKey(0)
    k_small, k_large = jax.random.split(key)

    # Small discriminator-output-like tensor: NCHW = (2, 4, 16, 16)  -> single-block path.
    d_out_S = jax.random.normal(k_small, (2, 4, 16, 16), dtype=jnp.float32)
    loss = jax.block_until_ready(criterion_adv_for_g(d_out_S))
    ref = -jnp.mean(d_out_S)
    assert jnp.allclose(loss, ref, rtol=1e-6, atol=1e-6), (loss, ref)

    # Larger tensor to exercise the tiled + megacore-split path: (8, 8, 256, 256) f32 (16 MiB).
    d_large = jax.random.normal(k_large, (8, 8, 256, 256), dtype=jnp.float32) * 0.1 + 0.5
    loss_l = jax.block_until_ready(criterion_adv_for_g(d_large))
    ref_l = -jnp.mean(d_large)
    assert jnp.allclose(loss_l, ref_l, rtol=1e-5, atol=1e-5), (loss_l, ref_l)

    print("KERNEL_OK")
</pallas_src>

<mosaic_0001>
module attributes {stable_mosaic.version = 11 : i64} {
  func.func @_neg_mean_single_kernel(%arg0: i32, %arg1: memref<8x256xf32, #tpu.memory_space<vmem>>, %arg2: memref<1x1xf32, #tpu.memory_space<smem>>) attributes {dimension_semantics = [#tpu.dimension_semantics<arbitrary>], iteration_bounds = array<i64: 1>, scalar_prefetch = 0 : i64, scratch_operands = 0 : i64, tpu.core_type = #tpu.core_type<tc>, window_params = [{pipeline_mode = #tpu.pipeline_mode<synchronous>, transform_indices = @transform_0, window_bounds = array<i64: 8, 256>}, {transform_indices = @transform_1, window_bounds = array<i64: 1, 1>}]} {
    %c0 = arith.constant 0 : index
    %c0_0 = arith.constant 0 : index
    %0 = vector.load %arg1[%c0, %c0_0] : memref<8x256xf32, #tpu.memory_space<vmem>>, vector<8x256xf32>
    %1 = vector.shape_cast %0 : vector<8x256xf32> to vector<1x8x256xf32>
    %cst = arith.constant dense<0.000000e+00> : vector<1xf32>
    %2 = vector.multi_reduction <add>, %1, %cst [1, 2] : vector<1x8x256xf32> to vector<1xf32>
    %3 = vector.shape_cast %2 : vector<1xf32> to vector<1x1x1xf32>
    %4 = vector.extract %3[0, 0, 0] : f32 from vector<1x1x1xf32>
    %cst_1 = arith.constant 0.000000e+00 : f32
    %5 = arith.subf %cst_1, %4 : f32
    %cst_2 = arith.constant 2.048000e+03 : f32
    %6 = arith.divf %5, %cst_2 : f32
    %c0_3 = arith.constant 0 : index
    %c0_4 = arith.constant 0 : index
    %7 = memref.load %arg2[%c0_3, %c0_4] : memref<1x1xf32, #tpu.memory_space<smem>>
    memref.store %6, %arg2[%c0_3, %c0_4] : memref<1x1xf32, #tpu.memory_space<smem>>
    return
  }
  func.func @transform_0(%arg0: i32) -> (i32, i32) {
    %c0_i32 = arith.constant 0 : i32
    %c0_i32_0 = arith.constant 0 : i32
    %c0_i32_1 = arith.constant 0 : i32
    return %c0_i32, %c0_i32_0 : i32, i32
  }
  func.func @transform_1(%arg0: i32) -> (i32, i32) {
    %c0_i32 = arith.constant 0 : i32
    %c0_i32_0 = arith.constant 0 : i32
    %c0_i32_1 = arith.constant 0 : i32
    return %c0_i32, %c0_i32_0 : i32, i32
  }
}

</mosaic_0001>

<bundles_post_ra>
// kernel: tpu_custom_call.1
= control target key start
LH: loop header
LB: loop body
LE: loop exit
PB: predicated region body
PF: predicated region fallthrough
CT: control target
= control target key end

     0   :  { %6 = vsyncpa [#allocation3], 0  ;;  %s131_s0 = inlined_call_operand.hbm [shape: f32[8,256], index: 0, kind: input, shape index: {}]   ;;  %s132_s1 = inlined_call_operand.hbm [shape: f32[1,1], index: 1, kind: output, shape index: {}]  }
   0x1   :  { %7 = vsyncpa [#allocation4], 0  ;;  %s13_s8 = sshll.u32 %s131_s0, 4  ;;  %s112_s9 = smov [#allocation2]   ;;  %s14_s8 = int_to_ptr.hbm [resolvable:$true] %s13_s8 }
   0x2   :  { %s15_s10 = sshll.u32 %s112_s9, 4  ;;  %s16_s10 = int_to_ptr.vmem [resolvable:$true] %s15_s10 }
   0x3   :  { %18 = dma.hbm_to_vmem [thread:$0]  %s14_s8, 256, %s16_s10, [#allocation3]  }
   0x4   :  { %108 = dma.done.wait [#allocation3], 256  }
   0x5   :  { %109 = vsyncadd [#allocation3], 4294967040  ;;  %v23_v0 = vld [vmem:[#allocation2] sm:$0xff]  ;;  %v24_v1 = vld [vmem:[#allocation2 + $0x8] sm:$0xff]  ;;  %v113_v3 = vmov 2048.0   ;;  %s52_s12 = sshll.u32 %s132_s1, 4  ;;  %s53_s12 = int_to_ptr.hbm [resolvable:$true] %s52_s12 }
   0x6   :  { %v25_v2 = vadd.f32 %v24_v1, %v23_v0  ;;  %70 = vrcp.f32 %v113_v3  ;;  %s114_s17 = smov [#allocation5]  }
   0x8   :  { %26 = vadd.xlane.f32.xlu0 %v25_v2 }
   0xc   :  { %v71_v4 = vpop.eup %70 }
   0xd   :  { %v37_v5 = vmul.f32 2048.0, %v71_v4  ;;  %vm41_vm0 = vweird.f32 %v71_v4 }
   0xf   :  { %v38_v6 = vsub.f32 1.0, %v37_v5 }
  0x11   :  { %v39_v10 = vmul.f32 %v71_v4, %v38_v6 }
  0x13   :  { %v40_v13 = vadd.f32 %v71_v4, %v39_v10 }
  0x15   :  { %v42_v16 = vsel %vm41_vm0, %v71_v4, %v40_v13 }
  0x7b   :  { %v27_v7 = vpop.xlane.xlu0 %26 }
  0x7c   :  { %v28_v8 = vrot.slane %v27_v7, 4 }
  0x7e   :  { %v29_v9 = vadd.f32 %v28_v8, %v27_v7 }
  0x80   :  { %v30_v11 = vrot.slane %v29_v9, 2 }
  0x82   :  { %v31_v12 = vadd.f32 %v30_v11, %v29_v9 }
  0x84   :  { %v32_v14 = vrot.slane %v31_v12, 1 }
  0x86   :  { %v33_v15 = vadd.f32 %v32_v14, %v31_v12 }
  0x88   :  { %63 = vpush %v33_v15 }
  0x89   :  { %65 = vpush %v42_v16 }
  0xb9   :  { %s64_s13 = spop %63 }
  0xba   :  { %s35_s14 = ssub.f32 0.0, %s64_s13  ;;  %s66_s15 = spop %65 }
  0xbc   :  { %s44_s16 = smul.f32 %s66_s15, %s35_s14 }
  0xbe   :  { %46 = sst [smem:[#allocation5]] %s44_s16 }
  0xbf   :  { %55 = dma.smem_to_hbm %s114_s17, 16, %s53_s12, [#allocation4]  }
  0xc0   :  { %110 = dma.done.wait [#allocation4], 16  }
  0xc1   :  { %111 = vsyncadd [#allocation4], 4294967280 }
  0xc2   :  { %60 = sfence }
  0xc3   :  { %61 = vsyncpa [#allocation3], 1 }
  0xc4   :  { %62 = vsyncpa [#allocation4], 1 }

</bundles_post_ra>
